<compile_context>
chip_gen: v7x
topology: tpu7x:2x2x1
jax: 0.10.0
libtpu: 0.0.40
codegen_flags: <defaults>
</compile_context>

<pallas_src>
import numpy as np
import jax
import jax.numpy as jnp
from jax import lax
from jax.experimental import pallas as pl
from jax.experimental.pallas import tpu as pltpu


K_SUB = 16     # sublane-padded #ntypes used for the counts accumulator (bf16-tile clean)
K_OUT = 128    # lane-padded logits width (sliced back to num_ntypes after the call)


def _round_up(x, m):
    return ((x + m - 1) // m) * m


def node_type_predictor_kernel(tgt_ref, snt_ref, m_ref, b_ref, out_ref, acc_ref):
    # tgt_ref : (1, TE)        int32  target node id of each contribution (-1 = pad)
    # snt_ref : (1, TE)        int32  source-node ntype of each contribution (-1 = pad)
    # m_ref   : (K_SUB, K_OUT) f32    emb @ W^T, zero padded
    # b_ref   : (1, K_OUT)     f32    classifier bias, zero padded
    # out_ref : (TN, K_OUT)    f32    logits block (resident across the edge axis)
    # acc_ref : (TN, K_SUB)    f32    per-node, per-source-ntype contribution counts
    i = pl.program_id(0)                      # node tile (parallel)
    j = pl.program_id(1)                      # edge tile (trailing reduction)
    tn = acc_ref.shape[0]
    te = tgt_ref.shape[1]

    @pl.when(j == 0)
    def _init():
        acc_ref[...] = jnp.zeros_like(acc_ref)

    tgt = tgt_ref[...]                        # (1, TE)
    snt = snt_ref[...]                        # (1, TE)

    # Scatter one-hot: row n (global node id i*TN + n) matches its contributions.
    node_iota = lax.broadcasted_iota(jnp.int32, (tn, te), 0) + i * tn
    scatter_oh = (node_iota == tgt).astype(jnp.bfloat16)        # (TN, TE)

    # Gather one-hot: row k matches contributions whose source ntype == k.
    type_iota = lax.broadcasted_iota(jnp.int32, (K_SUB, te), 0)
    gather_oh = (type_iota == snt).astype(jnp.bfloat16)         # (K_SUB, TE)

    # counts[n, k] += #contributions to node n coming from source ntype k
    # (contract over the shared lane axis TE; 0/1 in bf16 is exact, f32 accumulate).
    acc_ref[...] += lax.dot_general(
        scatter_oh, gather_oh,
        dimension_numbers=(((1,), (1,)), ((), ())),
        preferred_element_type=jnp.float32)                     # (TN, K_SUB)

    @pl.when(j == pl.num_programs(1) - 1)
    def _finalize():
        counts = acc_ref[...]                                   # (TN, K_SUB)
        deg = jnp.maximum(jnp.sum(counts, axis=1, keepdims=True), 1.0)
        logits = jnp.dot(counts, m_ref[...],
                         preferred_element_type=jnp.float32)    # (TN, K_OUT)
        # Exact divide (pl.reciprocal(approx=True) would loosen the 1e-5 tolerance).
        out_ref[...] = logits / deg + b_ref[...]


def node_type_predictor(tgt, snt, embeddings, w, b, n_nodes,
                        *, tn_max=256, te_max=2048):
    """tgt/snt: 1-D int32 contribution lists (target node id, source-node ntype);
    embeddings: (K, D); w: (K, D) classifier weight; b: (K,) classifier bias."""
    n_types, _ = embeddings.shape
    assert n_types <= K_SUB

    # Fold the classifier into a per-ntype logit table: M = emb @ W^T  (K, K).
    m = jnp.dot(embeddings, w.T, precision=jax.lax.Precision.HIGHEST)
    m_pad = jnp.zeros((K_SUB, K_OUT), jnp.float32).at[:n_types, :n_types].set(m)
    b_pad = jnp.zeros((1, K_OUT), jnp.float32).at[0, :n_types].set(b)

    # Pad the contribution list to a lane-aligned edge tile (-1 matches nothing).
    e2 = int(tgt.shape[0])
    te = min(te_max, _round_up(e2, 128))
    e2_pad = _round_up(e2, te)
    tgt_p = jnp.full((1, e2_pad), -1, jnp.int32).at[0, :e2].set(tgt.astype(jnp.int32))
    snt_p = jnp.full((1, e2_pad), -1, jnp.int32).at[0, :e2].set(snt.astype(jnp.int32))

    # Node tiling (multiple of 16 keeps bf16 sublane packing clean).
    tn = min(tn_max, _round_up(n_nodes, 16))
    n_pad = _round_up(n_nodes, tn)

    grid = (n_pad // tn, e2_pad // te)
    flops = 2 * n_pad * e2_pad * K_SUB + 2 * n_pad * K_SUB * K_OUT
    bytes_accessed = 4 * (2 * e2_pad * grid[0] + n_pad * K_OUT + K_SUB * K_OUT)

    out = pl.pallas_call(
        node_type_predictor_kernel,
        out_shape=jax.ShapeDtypeStruct((n_pad, K_OUT), jnp.float32),
        grid_spec=pltpu.PrefetchScalarGridSpec(
            num_scalar_prefetch=0,
            grid=grid,
            in_specs=[
                pl.BlockSpec((1, te), lambda i, j: (0, j)),         # tgt
                pl.BlockSpec((1, te), lambda i, j: (0, j)),         # snt
                pl.BlockSpec((K_SUB, K_OUT), lambda i, j: (0, 0)),  # emb @ W^T
                pl.BlockSpec((1, K_OUT), lambda i, j: (0, 0)),      # bias
            ],
            out_specs=pl.BlockSpec((tn, K_OUT), lambda i, j: (i, 0)),
            scratch_shapes=[pltpu.VMEM((tn, K_SUB), jnp.float32)],
        ),
        compiler_params=pltpu.CompilerParams(
            dimension_semantics=("parallel", "arbitrary")),
        cost_estimate=pl.CostEstimate(
            flops=flops, transcendentals=0, bytes_accessed=bytes_accessed),
    )(tgt_p, snt_p, m_pad, b_pad)

    return out[:n_nodes, :n_types]


if __name__ == "__main__":
    key = jax.random.PRNGKey(0)

    # ---- synthetic heterogeneous graph -------------------------------------
    n_types = 4                      # len(g.ntypes)
    nodes_per_type = 6
    n_nodes = n_types * nodes_per_type          # g.number_of_nodes() = 24
    embed_dim = 32
    n_etypes = 2
    edges_per_etype = 10

    # ntype_dict: contiguous blocks of node ids per ntype (as in __init__)
    ntype_dict = np.repeat(np.arange(n_types, dtype=np.int32), nodes_per_type)

    # random edges per canonical etype
    k_e, k_emb, k_w, k_b = jax.random.split(key, 4)
    edge_keys = jax.random.split(k_e, 2 * n_etypes)
    srcs, dsts = [], []
    for i in range(n_etypes):
        srcs.append(np.asarray(
            jax.random.randint(edge_keys[2 * i], (edges_per_etype,), 0, n_nodes),
            dtype=np.int32))
        dsts.append(np.asarray(
            jax.random.randint(edge_keys[2 * i + 1], (edges_per_etype,), 0, n_nodes),
            dtype=np.int32))

    # Flatten both scatter directions across all etypes into one contribution list:
    #   (target node, source-node ntype)
    tgt_list, snt_list = [], []
    for src, dst in zip(srcs, dsts):
        tgt_list.append(dst); snt_list.append(ntype_dict[src])   # dst += emb[ntype[src]]
        tgt_list.append(src); snt_list.append(ntype_dict[dst])   # src += emb[ntype[dst]]
    tgt_np = np.concatenate(tgt_list).astype(np.int32)           # (E2,)
    snt_np = np.concatenate(snt_list).astype(np.int32)           # (E2,)

    # ---- deterministic parameters ------------------------------------------
    # xavier_uniform_ on embeddings (K, D)
    bound = float(np.sqrt(6.0 / (n_types + embed_dim)))
    embeddings = jax.random.uniform(
        k_emb, (n_types, embed_dim), jnp.float32, -bound, bound)
    # nn.Linear(embed_dim, n_types): weight (K, D), bias (K,)
    w_bound = float(1.0 / np.sqrt(embed_dim))
    w = jax.random.uniform(k_w, (n_types, embed_dim), jnp.float32, -w_bound, w_bound)
    b = jax.random.uniform(k_b, (n_types,), jnp.float32, -w_bound, w_bound)

    out = node_type_predictor(jnp.asarray(tgt_np), jnp.asarray(snt_np),
                              embeddings, w, b, n_nodes)
    out = jax.block_until_ready(out)

    # ---- pure-numpy reference (mirrors the PyTorch forward) ----------------
    emb_np = np.asarray(embeddings)
    all_neighbors = np.zeros((n_nodes, embed_dim), dtype=np.float32)
    in_deg = np.zeros(n_nodes, dtype=np.int64)
    for src, dst in zip(srcs, dsts):
        np.add.at(all_neighbors, dst, emb_np[ntype_dict[src]])
        np.add.at(all_neighbors, src, emb_np[ntype_dict[dst]])
        in_deg += np.bincount(dst, minlength=n_nodes)
        in_deg += np.bincount(src, minlength=n_nodes)
    deg = np.clip(in_deg.astype(np.float32), 1.0, None)
    h_ref = all_neighbors / deg[:, None]
    ref = h_ref @ np.asarray(w).T + np.asarray(b)

    np.testing.assert_allclose(np.asarray(out), ref, rtol=1e-5, atol=1e-5)
    print("KERNEL_OK")
</pallas_src>

<mosaic_0001>
module attributes {stable_mosaic.version = 11 : i64} {
  func.func @node_type_predictor_kernel(%arg0: i32, %arg1: i32, %arg2: memref<1x128xi32, #tpu.memory_space<vmem>>, %arg3: memref<1x128xi32, #tpu.memory_space<vmem>>, %arg4: memref<16x128xf32, #tpu.memory_space<vmem>>, %arg5: memref<1x128xf32, #tpu.memory_space<vmem>>, %arg6: memref<32x128xf32, #tpu.memory_space<vmem>>, %arg7: memref<32x16xf32, #tpu.memory_space<vmem>>) attributes {dimension_semantics = [#tpu.dimension_semantics<parallel>, #tpu.dimension_semantics<arbitrary>], iteration_bounds = array<i64: 1, 1>, scalar_prefetch = 0 : i64, scratch_operands = 1 : i64, tpu.core_type = #tpu.core_type<tc>, window_params = [{transform_indices = @transform_0, window_bounds = array<i64: 1, 128>}, {transform_indices = @transform_1, window_bounds = array<i64: 1, 128>}, {pipeline_mode = #tpu.pipeline_mode<synchronous>, transform_indices = @transform_2, window_bounds = array<i64: 16, 128>}, {pipeline_mode = #tpu.pipeline_mode<synchronous>, transform_indices = @transform_3, window_bounds = array<i64: 1, 128>}, {transform_indices = @transform_4, window_bounds = array<i64: 32, 128>}]} {
    %c0_i32 = arith.constant 0 : i32
    %0 = arith.cmpi eq, %arg1, %c0_i32 : i32
    %1 = arith.extui %0 : i1 to i32
    %c0_i32_0 = arith.constant 0 : i32
    %2 = arith.cmpi ne, %1, %c0_i32_0 : i32
    scf.if %2 {
      %cst_10 = arith.constant 0.000000e+00 : f32
      %27 = vector.broadcast %cst_10 : f32 to vector<32x16xf32>
      %c0_11 = arith.constant 0 : index
      %c0_12 = arith.constant 0 : index
      %28 = vector.load %arg7[%c0_11, %c0_12] : memref<32x16xf32, #tpu.memory_space<vmem>>, vector<32x16xf32>
      tpu.vector_store %arg7[%c0_11, %c0_12], %27 {strides = array<i32>} : memref<32x16xf32, #tpu.memory_space<vmem>>, vector<32x16xf32>,
    } else {
    }
    %c0 = arith.constant 0 : index
    %c0_1 = arith.constant 0 : index
    %3 = vector.load %arg2[%c0, %c0_1] : memref<1x128xi32, #tpu.memory_space<vmem>>, vector<1x128xi32>
    %c0_2 = arith.constant 0 : index
    %c0_3 = arith.constant 0 : index
    %4 = vector.load %arg3[%c0_2, %c0_3] : memref<1x128xi32, #tpu.memory_space<vmem>>, vector<1x128xi32>
    %5 = tpu.iota {dimensions = array<i32: 0>} : vector<32x128xi32>
    %c32_i32 = arith.constant 32 : i32
    %6 = arith.muli %arg0, %c32_i32 : i32
    %7 = vector.broadcast %6 : i32 to vector<32x128xi32>
    %8 = arith.addi %5, %7 : vector<32x128xi32>
    %9 = vector.broadcast %3 : vector<1x128xi32> to vector<32x128xi32>
    %10 = arith.cmpi eq, %8, %9 : vector<32x128xi32>
    %11 = arith.extui %10 : vector<32x128xi1> to vector<32x128xi32>
    %12 = arith.sitofp %11 : vector<32x128xi32> to vector<32x128xf32>
    %13 = arith.truncf %12 : vector<32x128xf32> to vector<32x128xbf16>
    %14 = tpu.iota {dimensions = array<i32: 0>} : vector<16x128xi32>
    %15 = vector.broadcast %4 : vector<1x128xi32> to vector<16x128xi32>
    %16 = arith.cmpi eq, %14, %15 : vector<16x128xi32>
    %17 = arith.extui %16 : vector<16x128xi1> to vector<16x128xi32>
    %18 = arith.sitofp %17 : vector<16x128xi32> to vector<16x128xf32>
    %19 = arith.truncf %18 : vector<16x128xf32> to vector<16x128xbf16>
    %c0_4 = arith.constant 0 : index
    %c0_5 = arith.constant 0 : index
    %20 = vector.load %arg7[%c0_4, %c0_5] : memref<32x16xf32, #tpu.memory_space<vmem>>, vector<32x16xf32>
    %cst = arith.constant dense<0.000000e+00> : vector<32x16xf32>
    %21 = tpu.matmul %13, %19, %cst {dimension_numbers = #tpu.dot_dimension_numbers<[1], [1], [0], [0], [0, 0, 1, 0], [], []>} : vector<32x128xbf16>, vector<16x128xbf16>, vector<32x16xf32> -> vector<32x16xf32>
    %22 = arith.addf %20, %21 : vector<32x16xf32>
    %c0_6 = arith.constant 0 : index
    %c0_7 = arith.constant 0 : index
    %23 = vector.load %arg7[%c0_6, %c0_7] : memref<32x16xf32, #tpu.memory_space<vmem>>, vector<32x16xf32>
    tpu.vector_store %arg7[%c0_6, %c0_7], %22 {strides = array<i32>} : memref<32x16xf32, #tpu.memory_space<vmem>>, vector<32x16xf32>,
    %c0_i32_8 = arith.constant 0 : i32
    %24 = arith.cmpi eq, %arg1, %c0_i32_8 : i32
    %25 = arith.extui %24 : i1 to i32
    %c0_i32_9 = arith.constant 0 : i32
    %26 = arith.cmpi ne, %25, %c0_i32_9 : i32
    scf.if %26 {
      %c0_10 = arith.constant 0 : index
      %c0_11 = arith.constant 0 : index
      %27 = vector.load %arg7[%c0_10, %c0_11] : memref<32x16xf32, #tpu.memory_space<vmem>>, vector<32x16xf32>
      %cst_12 = arith.constant dense<0.000000e+00> : vector<32xf32>
      %28 = vector.multi_reduction <add>, %27, %cst_12 [1] : vector<32x16xf32> to vector<32xf32>
      %29 = vector.shape_cast %28 : vector<32xf32> to vector<32x1xf32>
      %cst_13 = arith.constant 1.000000e+00 : f32
      %30 = vector.broadcast %cst_13 : f32 to vector<32x1xf32>
      %31 = arith.maximumf %29, %30 : vector<32x1xf32>
      %c0_14 = arith.constant 0 : index
      %c0_15 = arith.constant 0 : index
      %32 = vector.load %arg4[%c0_14, %c0_15] : memref<16x128xf32, #tpu.memory_space<vmem>>, vector<16x128xf32>
      %cst_16 = arith.constant dense<0.000000e+00> : vector<32x128xf32>
      %33 = tpu.matmul %27, %32, %cst_16 {dimension_numbers = #tpu.dot_dimension_numbers<[1], [0], [0], [1], [0, 0, 1, 1], [], []>} : vector<32x16xf32>, vector<16x128xf32>, vector<32x128xf32> -> vector<32x128xf32>
      %34 = vector.broadcast %31 : vector<32x1xf32> to vector<32x128xf32>
      %35 = arith.divf %33, %34 : vector<32x128xf32>
      %c0_17 = arith.constant 0 : index
      %c0_18 = arith.constant 0 : index
      %36 = vector.load %arg5[%c0_17, %c0_18] : memref<1x128xf32, #tpu.memory_space<vmem>>, vector<1x128xf32>
      %37 = vector.broadcast %36 : vector<1x128xf32> to vector<32x128xf32>
      %38 = arith.addf %35, %37 : vector<32x128xf32>
      %c0_19 = arith.constant 0 : index
      %c0_20 = arith.constant 0 : index
      %39 = vector.load %arg6[%c0_19, %c0_20] : memref<32x128xf32, #tpu.memory_space<vmem>>, vector<32x128xf32>
      tpu.vector_store %arg6[%c0_19, %c0_20], %38 {strides = array<i32>} : memref<32x128xf32, #tpu.memory_space<vmem>>, vector<32x128xf32>,
    } else {
    }
    return
  }
  func.func @transform_0(%arg0: i32, %arg1: i32) -> (i32, i32) {
    %c0_i32 = arith.constant 0 : i32
    %c0_i32_0 = arith.constant 0 : i32
    return %c0_i32, %arg1 : i32, i32
  }
  func.func @transform_1(%arg0: i32, %arg1: i32) -> (i32, i32) {
    %c0_i32 = arith.constant 0 : i32
    %c0_i32_0 = arith.constant 0 : i32
    return %c0_i32, %arg1 : i32, i32
  }
  func.func @transform_2(%arg0: i32, %arg1: i32) -> (i32, i32) {
    %c0_i32 = arith.constant 0 : i32
    %c0_i32_0 = arith.constant 0 : i32
    %c0_i32_1 = arith.constant 0 : i32
    return %c0_i32, %c0_i32_0 : i32, i32
  }
  func.func @transform_3(%arg0: i32, %arg1: i32) -> (i32, i32) {
    %c0_i32 = arith.constant 0 : i32
    %c0_i32_0 = arith.constant 0 : i32
    %c0_i32_1 = arith.constant 0 : i32
    return %c0_i32, %c0_i32_0 : i32, i32
  }
  func.func @transform_4(%arg0: i32, %arg1: i32) -> (i32, i32) {
    %c0_i32 = arith.constant 0 : i32
    %c0_i32_0 = arith.constant 0 : i32
    return %arg0, %c0_i32 : i32, i32
  }
}

</mosaic_0001>

<bundles_post_ra>
// kernel: tpu_custom_call.1
= control target key start
LH: loop header
LB: loop body
LE: loop exit
PB: predicated region body
PF: predicated region fallthrough
CT: control target
= control target key end

     0   :  { %9 = vsyncpa [#allocation4], 0  ;;  %s559_s0 = inlined_call_operand.hbm [shape: s32[1,128], index: 0, kind: input, shape index: {}]   ;;  %s560_s1 = inlined_call_operand.vmem [shape: s32[1,128], index: 1, kind: input, shape index: {}]   ;;  %s561_s2 = inlined_call_operand.hbm [shape: f32[16,128], index: 2, kind: input, shape index: {}]   ;;  %s562_s3 = inlined_call_operand.vmem [shape: f32[1,128], index: 3, kind: input, shape index: {}]   ;;  %s563_s4 = inlined_call_operand.hbm [shape: f32[32,128], index: 4, kind: output, shape index: {}]  }
   0x1   :  { %10 = vsyncpa [#allocation7], 0 }
   0x2   :  { %11 = vsyncpa [#allocation5], 0  ;;  %s456_s15 = smov [#allocation3]   ;;  %s457_s17 = smov [#allocation6]  }
   0x3   :  { %s18_s16 = sshll.u32 %s456_s15, 4  ;;  %s29_s18 = sshll.u32 %s457_s17, 4  ;;  %s19_s16 = int_to_ptr.vmem [resolvable:$true] %s18_s16  ;;  %s488_s18 = int_to_ptr.vmem [resolvable:$true] %s29_s18 }
   0x4   :  { %s384_s21 = scalar_lea.hbm %s559_s0, 16 }
   0x5   :  { %p385_p0 = scmp.ne.s32.totalorder %s559_s0, %s384_s21  ;;  %p388_p1 = scmp.lt.u32.totalorder %s384_s21, %s559_s0 }
   0x7   :  { %p390_p2 = pnand %p388_p1, %p385_p0 }
   0x9   :  { %393 = shalt.err (!%p390_p2)
}
   0xa   :  { %s394_s26 = scalar_lea.vmem %s19_s16, 16  ;;  %s398_s27 = scalar_lea.vmem %s19_s16, 32 }
   0xb   :  { %p395_p3 = scmp.ne.s32.totalorder %s19_s16, %s394_s26  ;;  %p399_p4 = scmp.lt.s32.totalorder %s19_s16, %s19_s16 }
   0xc   :  { %p400_p5 = scmp.lt.s32.totalorder %s398_s27, %s394_s26 }
   0xe   :  { %p401_p6 = por %p400_p5, %p399_p4 }
  0x10   :  { %p402_p7 = pnand %p401_p6, %p395_p3 }
  0x12   :  { %405 = shalt.err (!%p402_p7)
}
  0x13   :  { %21 = dma.hbm_to_vmem [thread:$0]  %s559_s0, 16, %s19_s16, [#allocation4]  }
  0x14   :  { %s406_s6 = scalar_lea.hbm %s561_s2, 256 }
  0x15   :  { %p407_p8 = scmp.ne.s32.totalorder %s561_s2, %s406_s6  ;;  %p410_p9 = scmp.lt.u32.totalorder %s406_s6, %s561_s2 }
  0x17   :  { %p412_p10 = pnand %p410_p9, %p407_p8 }
  0x19   :  { %415 = shalt.err (!%p412_p10)
}
  0x1a   :  { %s416_s11 = scalar_lea.vmem %s488_s18, 256  ;;  %p421_p12 = scmp.lt.s32.totalorder %s488_s18, %s488_s18 }
  0x1b   :  { %p417_p11 = scmp.ne.s32.totalorder %s488_s18, %s416_s11  ;;  %p422_p13 = scmp.lt.s32.totalorder %s416_s11, %s416_s11 }
  0x1d   :  { %p423_p0 = por %p422_p13, %p421_p12 }
  0x1f   :  { %p424_p1 = pnand %p423_p0, %p417_p11 }
  0x21   :  { %427 = shalt.err (!%p424_p1)
}
  0x22   :  { %s458_s0 = smov 128   ;;  %s459_s12 = smov 8  }
  0x23   :  { %35 = dma.hbm_to_vmem [thread:$0]  %s561_s2, 256, %s488_s18, [#allocation7], %s458_s0, %s458_s0, %s459_s12  }
  0x24   :  { %450 = dma.done.wait [#allocation4], 16  }
  0x25   :  { %451 = vsyncadd [#allocation4], 4294967280 }
  0x26   :  { %452 = dma.done.wait [#allocation7], 256  }
  0x27   :  { %453 = vsyncadd [#allocation7], 4294967040  ;;  %v56_v0 = vlaneseq  ;;  %vm49_vm0 = vcmask 130048   ;;  %v460_v1 = vmov 0.0   ;;  %v326_v4 = vld [vmem:[%s560_s1] ss:$0 sm:$0xff] }
  0x28   :  { %52 = vst.msk [vmem:[#allocation2 + $0x10] sm:$0xff] %vm49_vm0, %v460_v1  ;;  %50 = vst.msk [vmem:[#allocation2] sm:$0xff] %vm49_vm0, %v460_v1  ;;  %v321_v5 = vld [vmem:[#allocation3] ss:$0 sm:$0xff]  ;;  %v461_v8 = vmov 1.0|1.0  }
  0x29   :  { %51 = vst.msk [vmem:[#allocation2 + $0x8] sm:$0xff] %vm49_vm0, %v460_v1  ;;  %53 = vst.msk [vmem:[#allocation2 + $0x18] sm:$0xff] %vm49_vm0, %v460_v1  ;;  %v57_v2 = vshrl.u32 %v56_v0, 7  ;;  %v181_v9 = vld [vmem:[#allocation6] sm:$0xff]  ;;  %v182_v10 = vld [vmem:[#allocation6 + $0x8] sm:$0xff]  ;;  %s462_s17 = smov [#allocation8]  }
  0x2a   :  { %v365_v11 = vpack.c.bf16 %v182_v10, %v181_v9  ;;  %v339_v42 = vld [vmem:[%s562_s3] ss:$0 sm:$0xff]  ;;  %s308_s18 = sshll.u32 %s462_s17, 4  ;;  %s309_s18 = int_to_ptr.vmem [resolvable:$true] %s308_s18 }
  0x2b   :  { %v58_v3 = vadd.s32 8, %v57_v2  ;;  %v59_v6 = vadd.s32 16, %v57_v2  ;;  %v60_v7 = vadd.s32 24, %v57_v2  ;;  %vm89_vm1 = vcmp.eq.s32.totalorder %v57_v2, %v326_v4  ;;  %s428_s3 = scalar_lea.vmem %s309_s18, 512  ;;  %p433_p3 = scmp.lt.s32.totalorder %s309_s18, %s309_s18 }
  0x2c   :  { %vm71_vm3 = vcmp.eq.s32.totalorder %v57_v2, %v321_v5  ;;  %366 = vmatprep.subr.bf16.mxu1 %v365_v11  ;;  %p429_p2 = scmp.ne.s32.totalorder %s309_s18, %s428_s3  ;;  %p434_p4 = scmp.lt.s32.totalorder %s428_s3, %s428_s3 }
  0x2d   :  { %vm90_vm2 = vcmp.eq.s32.totalorder %v58_v3, %v326_v4  ;;  %vm72_vm4 = vcmp.eq.s32.totalorder %v58_v3, %v321_v5  ;;  %vm73_vm7 = vcmp.eq.s32.totalorder %v59_v6, %v321_v5  ;;  %vm74_vm8 = vcmp.eq.s32.totalorder %v60_v7, %v321_v5  ;;  %368 = vmatpush3.bf16.msra.mxu1 %v365_v11 }
  0x2e   :  { %vm329_vm5 = vmpackc.low %vm90_vm2, %vm89_vm1  ;;  %p435_p5 = por %p434_p4, %p433_p3 }
  0x2f   :  { %349 = vmatprep.subr.msk.bf16.mxu0 %vm329_vm5, %v461_v8  ;;  %vm331_vm6 = vmpackc.low %vm72_vm4, %vm71_vm3  ;;  %v98_v12 = vld [vmem:[#allocation2 + $0x10] sm:$0xff]  ;;  %v96_v13 = vld [vmem:[#allocation2] sm:$0xff] }
  0x30   :  { %350 = vmatpush3.bf16.xpose.msk.msra.mxu0 %vm329_vm5, %v461_v8  ;;  %351 = vmatprep.mubr.msk.bf16.mxu0 %vm331_vm6, %v461_v8  ;;  %vm333_vm9 = vmpackc.low %vm74_vm8, %vm73_vm7  ;;  %v99_v15 = vld [vmem:[#allocation2 + $0x18] sm:$0xff]  ;;  %v97_v18 = vld [vmem:[#allocation2 + $0x8] sm:$0xff]  ;;  %p436_p6 = pnand %p435_p5, %p429_p2 }
  0x37   :  { %352 = vmatmul.mubr.msk.bf16.vlgmr.msra.gmra.mrb[0].mxu0 %vm333_vm9, %v461_v8 }
 0x10a   :  { %v353_v14 = vpop.f32.mrb[0].mxu0 }
 0x10b   :  { %v151_v16 = vadd.f32 %v353_v14, %v98_v12  ;;  %v134_v17 = vpop.f32.mrb[1].mxu0 }
 0x10c   :  { %v149_v19 = vadd.f32 %v134_v17, %v96_v13  ;;  %v354_v20 = vpop.f32.mrb[2].mxu0 }
 0x10d   :  { %156 = vst.msk [vmem:[#allocation2 + $0x10] sm:$0xff] %vm49_vm0, %v151_v16  ;;  %v152_v21 = vadd.f32 %v354_v20, %v99_v15  ;;  %v137_v22 = vpop.f32.mrb[3].mxu0 }
 0x10e   :  { %154 = vst.msk [vmem:[#allocation2] sm:$0xff] %vm49_vm0, %v149_v19  ;;  %v150_v23 = vadd.f32 %v137_v22, %v97_v18 }
 0x10f   :  { %157 = vst.msk [vmem:[#allocation2 + $0x18] sm:$0xff] %vm49_vm0, %v152_v21 }
 0x110   :  { %155 = vst.msk [vmem:[#allocation2 + $0x8] sm:$0xff] %vm49_vm0, %v150_v23 }
 0x114   :  { %v163_v24 = vld [vmem:[#allocation2 + $0x10] sm:$0xff] }
 0x115   :  { %v171_v25 = vsel %vm49_vm0, %v163_v24, 0.0  ;;  %v161_v26 = vld [vmem:[#allocation2] sm:$0xff] }
 0x116   :  { %172 = vadd.xlane.f32.xlu1 %v171_v25  ;;  %359 = vmatprep.mubr.msk.f32.mxu1 %vm49_vm0, %v161_v26  ;;  %v165_v27 = vsel %vm49_vm0, %v161_v26, 0.0  ;;  %v164_v28 = vld [vmem:[#allocation2 + $0x18] sm:$0xff] }
 0x117   :  { %166 = vadd.xlane.f32.xlu0 %v165_v27  ;;  %v162_v29 = vld [vmem:[#allocation2 + $0x8] sm:$0xff]  ;;  %v174_v30 = vsel %vm49_vm0, %v164_v28, 0.0 }
 0x118   :  { %360 = vmatmul.mubr.msk.f32.vlgmr.msra.gmra.mrb[0].mxu1 %vm49_vm0, %v162_v29  ;;  %v168_v31 = vsel %vm49_vm0, %v162_v29, 0.0 }
 0x119   :  { %362 = vmatprep.mubr.msk.f32.mxu1 %vm49_vm0, %v163_v24 }
 0x11a   :  { %175 = vadd.xlane.f32.xlu1 %v174_v30 }
 0x11b   :  { %169 = vadd.xlane.f32.xlu0 %v168_v31 }
 0x11c   :  { %363 = vmatmul.mubr.msk.f32.gmra.mrb[2].mxu1 %vm49_vm0, %v164_v28 }
 0x1a3   :  { %v173_v33 = vpop.xlane.xlu1 %172 }
 0x1a4   :  { %v167_v32 = vpop.xlane.xlu0 %166  ;;  %v179_v39 = vmax.f32 %v173_v33, 1.0 }
 0x1a5   :  { %v177_v36 = vmax.f32 %v167_v32, 1.0 }
 0x1a7   :  { %v176_v37 = vpop.xlane.xlu1 %175 }
 0x1a8   :  { %v170_v34 = vpop.xlane.xlu0 %169  ;;  %v180_v38 = vmax.f32 %v176_v37, 1.0 }
 0x1a9   :  { %v178_v35 = vmax.f32 %v170_v34, 1.0 }
 0x1ab   :  { %376 = vrcp.f32 %v178_v35 }
 0x1ac   :  { %378 = vrcp.f32 %v177_v36 }
 0x1ad   :  { %380 = vrcp.f32 %v180_v38 }
 0x1ae   :  { %382 = vrcp.f32 %v179_v39 }
 0x1b5   :  { %v377_v40 = vpop.eup %376 }
 0x1b6   :  { %v379_v43 = vpop.eup %378 }
 0x1b7   :  { %v381_v48 = vpop.eup %380 }
 0x1b8   :  { %v383_v51 = vpop.eup %382 }
 0x1eb   :  { %v361_v41 = vpop.f32.mrb[0].mxu1 }
 0x1ec   :  { %v283_v44 = vmul.f32 %v377_v40, %v361_v41  ;;  %v261_v45 = vpop.f32.mrb[1].mxu1 }
 0x1ed   :  { %v281_v46 = vmul.f32 %v379_v43, %v261_v45 }
 0x1ee   :  { %v296_v47 = vadd.f32 %v339_v42, %v283_v44 }
 0x1ef   :  { %v295_v49 = vadd.f32 %v339_v42, %v281_v46  ;;  %v364_v50 = vpop.f32.mrb[2].mxu1 }
 0x1f0   :  { %300 = vst [vmem:[#allocation8 + $0x8] sm:$0xff] %v296_v47  ;;  %v287_v52 = vmul.f32 %v381_v48, %v364_v50  ;;  %v271_v53 = vpop.f32.mrb[3].mxu1 }
 0x1f1   :  { %299 = vst [vmem:[#allocation8] sm:$0xff] %v295_v49  ;;  %v285_v54 = vmul.f32 %v383_v51, %v271_v53 }
 0x1f2   :  { %v298_v55 = vadd.f32 %v339_v42, %v287_v52 }
 0x1f3   :  { %v297_v56 = vadd.f32 %v339_v42, %v285_v54 }
 0x1f4   :  { %302 = vst [vmem:[#allocation8 + $0x18] sm:$0xff] %v298_v55 }
 0x1f5   :  { %301 = vst [vmem:[#allocation8 + $0x10] sm:$0xff] %v297_v56 }
 0x1f6   :  { %439 = shalt.err (!%p436_p6)
}
 0x1f7   :  { %s440_s21 = scalar_lea.hbm %s563_s4, 512 }
 0x1f8   :  { %p441_p7 = scmp.ne.s32.totalorder %s563_s4, %s440_s21  ;;  %p444_p8 = scmp.lt.u32.totalorder %s440_s21, %s563_s4 }
 0x1fa   :  { %p446_p9 = pnand %p444_p8, %p441_p7 }
 0x1fc   :  { %449 = shalt.err (!%p446_p9)
}
 0x1fd   :  { %314 = dma.vmem_to_hbm [thread:$0]  %s309_s18, 512, %s563_s4, [#allocation5], %s458_s0, %s458_s0, %s459_s12  }
 0x1fe   :  { %454 = dma.done.wait [#allocation5], 512  }
 0x1ff   :  { %455 = vsyncadd [#allocation5], 4294966784 }
 0x200   :  { %318 = vsyncpa [#allocation4], 1 }
 0x201   :  { %319 = vsyncpa [#allocation7], 1 }
 0x202   :  { %320 = vsyncpa [#allocation5], 1 }

</bundles_post_ra>
